<compile_context>
chip_gen: v7x
topology: tpu7x:2x2x1
jax: 0.10.0
libtpu: 0.0.40
codegen_flags: <defaults>
</compile_context>

<pallas_src>
import functools

import jax
import jax.numpy as jnp
from jax.experimental import pallas as pl
from jax.experimental.pallas import tpu as pltpu


def _round_up(x, m):
    return ((x + m - 1) // m) * m


def _num_tensorcores():
    """Best-effort TensorCores-per-chip query (v7x has 2, v5e/v6e have 1)."""
    try:
        info = pltpu.get_tpu_info()
        for name in ("num_cores", "core_count", "num_tensorcores", "tensorcore_count"):
            v = getattr(info, name, None)
            if isinstance(v, int) and 0 < v <= 16:
                return int(v)
    except Exception:
        pass
    try:
        kind = jax.devices()[0].device_kind.lower()
        if "v7" in kind or "7x" in kind:
            return 2
    except Exception:
        pass
    return 1


# ----------------------------------------------------------------------------
# Kernels
# ----------------------------------------------------------------------------
def _decoder_blockdiag_kernel(x_ref, w_ref, b_ref, o_ref):
    # (tm, K) @ (K, N) + bias on the MXU, f32 accumulation, lane-dense store.
    acc = jnp.dot(x_ref[...], w_ref[...], preferred_element_type=jnp.float32)
    acc = acc + b_ref[...].astype(jnp.float32)
    o_ref[...] = acc.astype(o_ref.dtype)


def _decoder_loop_kernel(x_ref, w_ref, b_ref, o_ref, *, num_slots, slot_size, out_dim):
    # Per-slot projection with the small shared weight; static unroll
    # (num_slots is compile-time).  The HBM writeback of the whole (tm, N)
    # output tile stays lane-dense; only the VMEM sub-stores are masked.
    w = w_ref[...]
    bias = b_ref[...].astype(jnp.float32)                      # (1, out_dim)
    for s in range(num_slots):
        xs = x_ref[:, s * slot_size:(s + 1) * slot_size]       # static slice
        acc = jnp.dot(xs, w, preferred_element_type=jnp.float32) + bias
        o_ref[:, s * out_dim:(s + 1) * out_dim] = acc.astype(o_ref.dtype)


# ----------------------------------------------------------------------------
# Wrapper
# ----------------------------------------------------------------------------
@functools.partial(jax.jit, static_argnames=("num_slots", "out_dim", "tm"))
def trajectory_to_slot_decoder(x, w, b, *, num_slots, out_dim, tm=2048):
    """
    x : [B, H, num_slots * slot_size]
    w : [slot_size, out_dim]   (transpose of torch Linear.weight)
    b : [out_dim]
    returns [B, H, num_slots * out_dim]
    """
    B, H, D = x.shape
    slot_size = D // num_slots
    assert D == num_slots * slot_size, (D, num_slots)
    assert w.shape == (slot_size, out_dim), w.shape
    assert b.shape == (out_dim,), b.shape

    M = B * H                   # streamed rows
    K = num_slots * slot_size   # contraction width seen by the kernel
    N = num_slots * out_dim     # lane-dense output width (== torch Flatten layout)

    x_itemsize = jnp.dtype(x.dtype).itemsize
    w_itemsize = jnp.dtype(w.dtype).itemsize
    out_dtype = x.dtype         # bf16 in -> bf16 out; accumulation stays f32

    # Path selection: block-diagonal fold is only worth it while the FLOP/weight
    # blowup (x num_slots) keeps the kernel memory-bound and the weight small.
    use_blockdiag = num_slots <= 8

    if use_blockdiag:
        w_resident_bytes = 2 * (K * N + N) * w_itemsize         # double-buffered
    else:
        w_resident_bytes = 2 * (slot_size * out_dim + out_dim) * w_itemsize

    def footprint(tm_):
        # double-buffered X tile + double-buffered out tile + resident weights
        return 2 * tm_ * K * x_itemsize + 2 * tm_ * N * x_itemsize + w_resident_bytes

    # ---- row-tile sizing (core-count aware, VMEM-budgeted) ------------------
    num_cores = _num_tensorcores()
    if M <= 256:
        tm_eff = M                              # tiny problem: one step
    elif num_cores == 1 and M <= 1024:
        tm_eff = M                              # single TC: one fat full-extent tile
    else:
        min_steps = 2 * num_cores               # >= 2 steps per TC -> per-core overlap
        tm_eff = min(_round_up(tm, 8),
                     max(8, _round_up(pl.cdiv(M, min_steps), 8)))
        tm_eff = min(tm_eff, _round_up(M, 8))

    VMEM_BUDGET = 24 << 20                      # headroom under every generation
    while tm_eff > 8 and footprint(tm_eff) > VMEM_BUDGET:
        tm_eff = max(8, _round_up(tm_eff // 2, 8))

    grid = (pl.cdiv(M, tm_eff),)

    # Raise scoped VMEM only when needed (v5e default is 16 MiB).
    fp = footprint(tm_eff)
    vmem_limit = None
    if fp > (12 << 20):
        vmem_limit = min(48 << 20, max(32 << 20, int(1.5 * fp)))

    x_flat = x.reshape(M, K)

    if use_blockdiag:
        # Block-diagonal weight: block (n, n) == w, zeros elsewhere.  Column
        # layout is [slot0_out | slot1_out | ...] == torch Flatten(start_dim=2).
        eye = jnp.eye(num_slots, dtype=w.dtype)
        w_arg = (eye[:, None, :, None] * w[None, :, None, :]).reshape(K, N)
        b_arg = jnp.tile(b, num_slots).reshape(1, N)
        kernel = _decoder_blockdiag_kernel
        w_spec = pl.BlockSpec((K, N), lambda i: (0, 0))          # resident
        b_spec = pl.BlockSpec((1, N), lambda i: (0, 0))          # resident
        flops = 2 * M * K * N
        w_bytes = (K * N + N) * w_itemsize
    else:
        w_arg = w
        b_arg = b.reshape(1, out_dim)
        kernel = functools.partial(
            _decoder_loop_kernel,
            num_slots=num_slots, slot_size=slot_size, out_dim=out_dim)
        w_spec = pl.BlockSpec((slot_size, out_dim), lambda i: (0, 0))
        b_spec = pl.BlockSpec((1, out_dim), lambda i: (0, 0))
        flops = 2 * M * K * out_dim
        w_bytes = (slot_size * out_dim + out_dim) * w_itemsize

    cost = pl.CostEstimate(
        flops=flops,
        transcendentals=0,
        bytes_accessed=x_itemsize * (M * K + M * N) + w_bytes,
    )

    out_flat = pl.pallas_call(
        kernel,
        out_shape=jax.ShapeDtypeStruct((M, N), out_dtype),
        grid_spec=pltpu.PrefetchScalarGridSpec(
            num_scalar_prefetch=0,
            grid=grid,
            in_specs=[
                pl.BlockSpec((tm_eff, K), lambda i: (i, 0)),     # streamed X tile
                w_spec,
                b_spec,
            ],
            out_specs=pl.BlockSpec((tm_eff, N), lambda i: (i, 0)),
        ),
        compiler_params=pltpu.CompilerParams(
            dimension_semantics=("parallel",),
            vmem_limit_bytes=vmem_limit,
        ),
        cost_estimate=cost,
    )(x_flat, w_arg, b_arg)

    return out_flat.reshape(B, H, N)


# ----------------------------------------------------------------------------
# Reference + init helpers
# ----------------------------------------------------------------------------
def init_params(key, slot_size, out_dim):
    # Deterministic init mirroring torch.nn.Linear default (uniform +/- 1/sqrt(fan_in)).
    kw, kb = jax.random.split(key)
    bound = 1.0 / jnp.sqrt(jnp.float32(slot_size))
    w = jax.random.uniform(kw, (slot_size, out_dim), jnp.float32, -bound, bound)
    b = jax.random.uniform(kb, (out_dim,), jnp.float32, -bound, bound)
    return w, b


def reference(x, w, b, num_slots, out_dim):
    B, H, D = x.shape
    slot_size = D // num_slots
    slots = x.reshape(B, H, num_slots, slot_size)
    proj = jnp.einsum("bhns,so->bhno", slots, w) + b
    return proj.reshape(B, H, num_slots * out_dim)


if __name__ == "__main__":
    key = jax.random.PRNGKey(0)
    kx, kp, kx2 = jax.random.split(key, 3)

    B, H = 2, 8
    slot_size = 128
    out_dim = 32

    # --- Path A: block-diagonal fold (num_slots <= 8), lane-dense N = 128 ---
    num_slots = 4
    x = jax.random.normal(kx, (B, H, num_slots * slot_size), jnp.float32)
    w, b = init_params(kp, slot_size, out_dim)

    out = trajectory_to_slot_decoder(x, w, b, num_slots=num_slots, out_dim=out_dim)
    out = jax.block_until_ready(out)
    ref = reference(x, w, b, num_slots, out_dim)
    assert out.shape == (B, H, num_slots * out_dim), out.shape
    assert jnp.allclose(out, ref, atol=1e-5, rtol=1e-5), "mismatch vs reference (block-diag path)"

    # --- Path B: per-slot loop (num_slots > 8), avoids the W_bd blowup --------
    num_slots2 = 16
    x2 = jax.random.normal(kx2, (B, H, num_slots2 * slot_size), jnp.float32)
    out2 = trajectory_to_slot_decoder(x2, w, b, num_slots=num_slots2, out_dim=out_dim)
    out2 = jax.block_until_ready(out2)
    ref2 = reference(x2, w, b, num_slots2, out_dim)
    assert out2.shape == (B, H, num_slots2 * out_dim), out2.shape
    assert jnp.allclose(out2, ref2, atol=1e-5, rtol=1e-5), "mismatch vs reference (loop path)"

    print("KERNEL_OK")
</pallas_src>

<mosaic_0001>
module attributes {stable_mosaic.version = 11 : i64} {
  func.func @_decoder_blockdiag_kernel(%arg0: i32, %arg1: memref<16x512xf32, #tpu.memory_space<vmem>>, %arg2: memref<512x128xf32, #tpu.memory_space<vmem>>, %arg3: memref<1x128xf32, #tpu.memory_space<vmem>>, %arg4: memref<16x128xf32, #tpu.memory_space<vmem>>) attributes {dimension_semantics = [#tpu.dimension_semantics<parallel>], iteration_bounds = array<i64: 1>, scalar_prefetch = 0 : i64, scratch_operands = 0 : i64, tpu.core_type = #tpu.core_type<tc>, window_params = [{transform_indices = @transform_0, window_bounds = array<i64: 16, 512>}, {pipeline_mode = #tpu.pipeline_mode<synchronous>, transform_indices = @transform_1, window_bounds = array<i64: 512, 128>}, {pipeline_mode = #tpu.pipeline_mode<synchronous>, transform_indices = @transform_2, window_bounds = array<i64: 1, 128>}, {transform_indices = @transform_3, window_bounds = array<i64: 16, 128>}]} {
    %c0 = arith.constant 0 : index
    %c0_0 = arith.constant 0 : index
    %0 = vector.load %arg1[%c0, %c0_0] : memref<16x512xf32, #tpu.memory_space<vmem>>, vector<16x512xf32>
    %c0_1 = arith.constant 0 : index
    %c0_2 = arith.constant 0 : index
    %1 = vector.load %arg2[%c0_1, %c0_2] : memref<512x128xf32, #tpu.memory_space<vmem>>, vector<512x128xf32>
    %cst = arith.constant dense<0.000000e+00> : vector<16x128xf32>
    %2 = tpu.matmul %0, %1, %cst {dimension_numbers = #tpu.dot_dimension_numbers<[1], [0], [0], [1], [0, 0, 1, 1], [], []>} : vector<16x512xf32>, vector<512x128xf32>, vector<16x128xf32> -> vector<16x128xf32>
    %c0_3 = arith.constant 0 : index
    %c0_4 = arith.constant 0 : index
    %3 = vector.load %arg3[%c0_3, %c0_4] : memref<1x128xf32, #tpu.memory_space<vmem>>, vector<1x128xf32>
    %4 = vector.broadcast %3 : vector<1x128xf32> to vector<16x128xf32>
    %5 = arith.addf %2, %4 : vector<16x128xf32>
    %c0_5 = arith.constant 0 : index
    %c0_6 = arith.constant 0 : index
    %6 = vector.load %arg4[%c0_5, %c0_6] : memref<16x128xf32, #tpu.memory_space<vmem>>, vector<16x128xf32>
    tpu.vector_store %arg4[%c0_5, %c0_6], %5 {strides = array<i32>} : memref<16x128xf32, #tpu.memory_space<vmem>>, vector<16x128xf32>,
    return
  }
  func.func @transform_0(%arg0: i32) -> (i32, i32) {
    %c0_i32 = arith.constant 0 : i32
    %c0_i32_0 = arith.constant 0 : i32
    return %arg0, %c0_i32 : i32, i32
  }
  func.func @transform_1(%arg0: i32) -> (i32, i32) {
    %c0_i32 = arith.constant 0 : i32
    %c0_i32_0 = arith.constant 0 : i32
    %c0_i32_1 = arith.constant 0 : i32
    return %c0_i32, %c0_i32_0 : i32, i32
  }
  func.func @transform_2(%arg0: i32) -> (i32, i32) {
    %c0_i32 = arith.constant 0 : i32
    %c0_i32_0 = arith.constant 0 : i32
    %c0_i32_1 = arith.constant 0 : i32
    return %c0_i32, %c0_i32_0 : i32, i32
  }
  func.func @transform_3(%arg0: i32) -> (i32, i32) {
    %c0_i32 = arith.constant 0 : i32
    %c0_i32_0 = arith.constant 0 : i32
    return %arg0, %c0_i32 : i32, i32
  }
}

</mosaic_0001>

<bundles_post_ra>
// kernel: tile.8
= control target key start
LH: loop header
LB: loop body
LE: loop exit
PB: predicated region body
PF: predicated region fallthrough
CT: control target
= control target key end

     0   :  { %s22_s0 = inlined_call_operand.vmem [shape: f32[32], index: 0, kind: input, shape index: {}]   ;;  %s23_s1 = inlined_call_operand.vmem [shape: f32[4,32], index: 1, kind: output, shape index: {}]  }
   0x1   :  { %v4_v0 = vld [vmem:[%s22_s0] ss:$0 sm:$0xff] }
   0x2   :  { %5 = vst [vmem:[%s23_s1] sm:$0xf] %v4_v0 }

// kernel: tile.9
= control target key start
LH: loop header
LB: loop body
LE: loop exit
PB: predicated region body
PF: predicated region fallthrough
CT: control target
= control target key end

     0   :  { %vm7_vm0 = vcmask 261120   ;;  %s37_s8 = smov 32   ;;  %s38_s9 = smov 64   ;;  %vm13_vm1 = vcmask 1048320   ;;  %vm19_vm2 = vcmask 785920   ;;  %vm25_vm3 = vcmask 523520   ;;  %s55_s0 = inlined_call_operand.vmem [shape: f32[4,32], index: 0, kind: input, shape index: {}]   ;;  %s56_s1 = inlined_call_operand.vmem [shape: f32[1,128], index: 1, kind: output, shape index: {}]  }
   0x1   :  { %v4_v0 = vld [vmem:[%s55_s0] sm:$0xf]  ;;  %s36_s0 = smov 96  }
   0x2   :  { %5 = vst [vmem:[#allocation1] sm:$0xf] %v4_v0 }
   0x9   :  { %v10_v1 = vld [vmem:[#allocation1 + $0x3] sm:$0x1]   ;;  %v22_v2 = vld [vmem:[#allocation1 + $0x1] sm:$0x1]   ;;  %v6_v3 = vld [vmem:[#allocation1] sm:$0x1]  }
   0xa   :  { %11 = vrot.lane.b32.xlu0 %v10_v1, %s36_s0  ;;  %23 = vrot.lane.b32.xlu1 %v22_v2, %s37_s8  ;;  %v16_v4 = vld [vmem:[#allocation1 + $0x2] sm:$0x1]   ;;  %8 = vst.msk [vmem:[#allocation0] sm:$0x1] %vm7_vm0, %v6_v3  }
   0xe   :  { %17 = vrot.lane.b32.xlu0 %v16_v4, %s38_s9 }
  0x7c   :  { %v12_v5 = vpop.permute.xlu0 %11   ;;  %v24_v6 = vpop.permute.xlu1 %23  }
  0x7d   :  { %14 = vst.msk [vmem:[#allocation0] sm:$0x1] %vm13_vm1, %v12_v5  }
  0x80   :  { %v18_v7 = vpop.permute.xlu0 %17  }
  0x81   :  { %20 = vst.msk [vmem:[#allocation0] sm:$0x1] %vm19_vm2, %v18_v7  }
  0x82   :  { %26 = vst.msk [vmem:[#allocation0] sm:$0x1] %vm25_vm3, %v24_v6  }
  0x89   :  { %v30_v8 = vld [vmem:[#allocation0] sm:$0x1] }
  0x8a   :  { %32 = vst [vmem:[%s56_s1] sm:$0x1] %v30_v8 }

// kernel: trajectory_to_slot_decoder.1
= control target key start
LH: loop header
LB: loop body
LE: loop exit
PB: predicated region body
PF: predicated region fallthrough
CT: control target
= control target key end

     0   :  { %s684_s0 = inlined_call_operand.vmem [shape: f32[16,512], index: 0, kind: input, shape index: {}]   ;;  %s685_s1 = inlined_call_operand.vmem [shape: f32[512,128], index: 1, kind: input, shape index: {}]   ;;  %s686_s2 = inlined_call_operand.vmem [shape: f32[1,128], index: 2, kind: input, shape index: {}]   ;;  %s687_s3 = inlined_call_operand.hbm [shape: f32[16,128], index: 3, kind: output, shape index: {}]  }
   0x1   :  { %v39_v0 = vld [vmem:[%s685_s1 + $0x80] sm:$0xff]  ;;  %v40_v1 = vld [vmem:[%s685_s1 + $0x88] sm:$0xff]  ;;  %v41_v11 = vld [vmem:[%s685_s1 + $0x90] sm:$0xff] }
   0x2   :  { %v23_v2 = vld [vmem:[%s685_s1] sm:$0xff]  ;;  %v339_v3 = vpack.c.bf16 %v40_v1, %v39_v0  ;;  %v24_v4 = vld [vmem:[%s685_s1 + $0x8] sm:$0xff]  ;;  %v42_v13 = vld [vmem:[%s685_s1 + $0x98] sm:$0xff] }
   0x3   :  { %v71_v5 = vld [vmem:[%s685_s1 + $0x180] sm:$0xff]  ;;  %v72_v6 = vld [vmem:[%s685_s1 + $0x188] sm:$0xff]  ;;  %v341_v7 = vpack.c.bf16 %v24_v4, %v23_v2  ;;  %v25_v14 = vld [vmem:[%s685_s1 + $0x10] sm:$0xff]  ;;  %v343_v16 = vpack.c.bf16 %v42_v13, %v41_v11 }
   0x4   :  { %v371_v8 = vpack.c.bf16 %v72_v6, %v71_v5  ;;  %v55_v9 = vld [vmem:[%s685_s1 + $0x100] sm:$0xff]  ;;  %v56_v10 = vld [vmem:[%s685_s1 + $0x108] sm:$0xff]  ;;  %340 = vmatprep.subr.bf16.mxu0 %v339_v3  ;;  %v26_v15 = vld [vmem:[%s685_s1 + $0x18] sm:$0xff] }
   0x5   :  { %v373_v12 = vpack.c.bf16 %v56_v10, %v55_v9  ;;  %342 = vmatpush3.bf16.msra.mxu0 %v341_v7  ;;  %v345_v17 = vpack.c.bf16 %v26_v15, %v25_v14  ;;  %v73_v18 = vld [vmem:[%s685_s1 + $0x190] sm:$0xff]  ;;  %v74_v19 = vld [vmem:[%s685_s1 + $0x198] sm:$0xff]  ;;  %v43_v23 = vld [vmem:[%s685_s1 + $0xa0] sm:$0xff] }
   0x6   :  { %372 = vmatprep.subr.bf16.mxu1 %v371_v8  ;;  %v57_v20 = vld [vmem:[%s685_s1 + $0x110] sm:$0xff]  ;;  %v375_v21 = vpack.c.bf16 %v74_v19, %v73_v18  ;;  %v58_v22 = vld [vmem:[%s685_s1 + $0x118] sm:$0xff]  ;;  %v44_v24 = vld [vmem:[%s685_s1 + $0xa8] sm:$0xff]  ;;  %344 = vmatprep.subr.bf16.mxu0 %v343_v16 }
   0x7   :  { %374 = vmatpush3.bf16.msra.mxu1 %v373_v12  ;;  %v377_v25 = vpack.c.bf16 %v58_v22, %v57_v20  ;;  %v347_v26 = vpack.c.bf16 %v44_v24, %v43_v23  ;;  %v27_v27 = vld [vmem:[%s685_s1 + $0x20] sm:$0xff]  ;;  %v28_v28 = vld [vmem:[%s685_s1 + $0x28] sm:$0xff]  ;;  %v45_v35 = vld [vmem:[%s685_s1 + $0xb0] sm:$0xff] }
   0x8   :  { %v75_v29 = vld [vmem:[%s685_s1 + $0x1a0] sm:$0xff]  ;;  %376 = vmatprep.subr.bf16.mxu1 %v375_v21  ;;  %v76_v30 = vld [vmem:[%s685_s1 + $0x1a8] sm:$0xff]  ;;  %v349_v33 = vpack.c.bf16 %v28_v28, %v27_v27  ;;  %v46_v36 = vld [vmem:[%s685_s1 + $0xb8] sm:$0xff] }
   0x9   :  { %v59_v31 = vld [vmem:[%s685_s1 + $0x120] sm:$0xff]  ;;  %v60_v32 = vld [vmem:[%s685_s1 + $0x128] sm:$0xff]  ;;  %346 = vmatpush3.bf16.msra.mxu0 %v345_v17  ;;  %v379_v34 = vpack.c.bf16 %v76_v30, %v75_v29  ;;  %v29_v37 = vld [vmem:[%s685_s1 + $0x30] sm:$0xff]  ;;  %v351_v39 = vpack.c.bf16 %v46_v36, %v45_v35 }
   0xa   :  { %348 = vmatprep.subr.bf16.mxu0 %v347_v26  ;;  %v381_v38 = vpack.c.bf16 %v60_v32, %v59_v31  ;;  %v30_v40 = vld [vmem:[%s685_s1 + $0x38] sm:$0xff]  ;;  %v77_v41 = vld [vmem:[%s685_s1 + $0x1b0] sm:$0xff]  ;;  %v47_v46 = vld [vmem:[%s685_s1 + $0xc0] sm:$0xff] }
   0xb   :  { %378 = vmatpush3.bf16.msra.mxu1 %v377_v25  ;;  %v78_v42 = vld [vmem:[%s685_s1 + $0x1b8] sm:$0xff]  ;;  %v61_v44 = vld [vmem:[%s685_s1 + $0x130] sm:$0xff]  ;;  %v48_v47 = vld [vmem:[%s685_s1 + $0xc8] sm:$0xff]  ;;  %v353_v48 = vpack.c.bf16 %v30_v40, %v29_v37 }
   0xc   :  { %380 = vmatprep.subr.bf16.mxu1 %v379_v34  ;;  %v383_v43 = vpack.c.bf16 %v78_v42, %v77_v41  ;;  %v62_v45 = vld [vmem:[%s685_s1 + $0x138] sm:$0xff]  ;;  %v79_v49 = vld [vmem:[%s685_s1 + $0x1c0] sm:$0xff]  ;;  %v80_v50 = vld [vmem:[%s685_s1 + $0x1c8] sm:$0xff]  ;;  %v355_v52 = vpack.c.bf16 %v48_v47, %v47_v46 }
   0xd   :  { %350 = vmatpush3.bf16.msra.mxu0 %v349_v33  ;;  %v385_v51 = vpack.c.bf16 %v62_v45, %v61_v44  ;;  %v31_v53 = vld [vmem:[%s685_s1 + $0x40] sm:$0xff]  ;;  %v32_v54 = vld [vmem:[%s685_s1 + $0x48] sm:$0xff]  ;;  %v387_v56 = vpack.c.bf16 %v80_v50, %v79_v49  ;;  %v49_v58 = vld [vmem:[%s685_s1 + $0xd0] sm:$0xff] }
   0xe   :  { %352 = vmatprep.subr.bf16.mxu0 %v351_v39  ;;  %v63_v55 = vld [vmem:[%s685_s1 + $0x140] sm:$0xff]  ;;  %v64_v57 = vld [vmem:[%s685_s1 + $0x148] sm:$0xff]  ;;  %v50_v59 = vld [vmem:[%s685_s1 + $0xd8] sm:$0xff]  ;;  %v357_v62 = vpack.c.bf16 %v32_v54, %v31_v53 }
   0xf   :  { %382 = vmatpush3.bf16.msra.mxu1 %v381_v38  ;;  %v81_v60 = vld [vmem:[%s685_s1 + $0x1d0] sm:$0xff]  ;;  %v82_v61 = vld [vmem:[%s685_s1 + $0x1d8] sm:$0xff]  ;;  %v389_v63 = vpack.c.bf16 %v64_v57, %v63_v55  ;;  %v359_v0 = vpack.c.bf16 %v50_v59, %v49_v58  ;;  %v51_v6 = vld [vmem:[%s685_s1 + $0xe0] sm:$0xff] }
  0x10   :  { %384 = vmatprep.subr.bf16.mxu1 %v383_v43  ;;  %v33_v1 = vld [vmem:[%s685_s1 + $0x50] sm:$0xff]  ;;  %v34_v2 = vld [vmem:[%s685_s1 + $0x58] sm:$0xff]  ;;  %v391_v4 = vpack.c.bf16 %v82_v61, %v81_v60  ;;  %v52_v7 = vld [vmem:[%s685_s1 + $0xe8] sm:$0xff] }
  0x11   :  { %354 = vmatpush3.bf16.msra.mxu0 %v353_v48  ;;  %v65_v3 = vld [vmem:[%s685_s1 + $0x150] sm:$0xff]  ;;  %v66_v5 = vld [vmem:[%s685_s1 + $0x158] sm:$0xff]  ;;  %v83_v8 = vld [vmem:[%s685_s1 + $0x1e0] sm:$0xff]  ;;  %v361_v10 = vpack.c.bf16 %v34_v2, %v33_v1  ;;  %v363_v14 = vpack.c.bf16 %v52_v7, %v51_v6 }
  0x12   :  { %356 = vmatprep.subr.bf16.mxu0 %v355_v52  ;;  %v84_v9 = vld [vmem:[%s685_s1 + $0x1e8] sm:$0xff]  ;;  %v35_v11 = vld [vmem:[%s685_s1 + $0x60] sm:$0xff]  ;;  %v393_v13 = vpack.c.bf16 %v66_v5, %v65_v3  ;;  %v53_v19 = vld [vmem:[%s685_s1 + $0xf0] sm:$0xff] }
  0x13   :  { %386 = vmatpush3.bf16.msra.mxu1 %v385_v51  ;;  %v36_v12 = vld [vmem:[%s685_s1 + $0x68] sm:$0xff]  ;;  %v67_v15 = vld [vmem:[%s685_s1 + $0x160] sm:$0xff]  ;;  %v395_v18 = vpack.c.bf16 %v84_v9, %v83_v8  ;;  %v54_v20 = vld [vmem:[%s685_s1 + $0xf8] sm:$0xff] }
  0x14   :  { %388 = vmatprep.subr.bf16.mxu1 %v387_v56  ;;  %v68_v16 = vld [vmem:[%s685_s1 + $0x168] sm:$0xff]  ;;  %v18_v21 = vld [vmem:[%s684_s0 + $0x18] sm:$0xff]  ;;  %v85_v22 = vld [vmem:[%s685_s1 + $0x1f0] sm:$0xff]  ;;  %v365_v24 = vpack.c.bf16 %v36_v12, %v35_v11 }
  0x15   :  { %358 = vmatpush3.bf16.msra.mxu0 %v357_v62  ;;  %v16_v17 = vld [vmem:[%s684_s0 + $0x8] sm:$0xff]  ;;  %v86_v23 = vld [vmem:[%s685_s1 + $0x1f8] sm:$0xff]  ;;  %233 = vmatprep.mubr.f32.mxu1 %v18_v21 }
  0x16   :  { %360 = vmatprep.subr.bf16.mxu0 %v359_v0  ;;  %158 = vmatprep.mubr.f32.mxu0 %v16_v17 }
  0x17   :  { %390 = vmatpush3.bf16.msra.mxu1 %v389_v63 }
  0x18   :  { %392 = vmatprep.subr.bf16.mxu1 %v391_v4 }
  0x19   :  { %362 = vmatpush3.bf16.msra.mxu0 %v361_v10 }
  0x1a   :  { %8 = vsyncpa [#allocation3], 0  ;;  %364 = vmatprep.subr.bf16.mxu0 %v363_v14  ;;  %v397_v25 = vpack.c.bf16 %v68_v16, %v67_v15  ;;  %v367_v26 = vpack.c.bf16 %v54_v20, %v53_v19  ;;  %v37_v27 = vld [vmem:[%s685_s1 + $0x70] sm:$0xff]  ;;  %v38_v28 = vld [vmem:[%s685_s1 + $0x78] sm:$0xff]  ;;  %v399_v29 = vpack.c.bf16 %v86_v23, %v85_v22 }
  0x1b   :  { %394 = vmatpush3.bf16.msra.mxu1 %v393_v13  ;;  %v69_v30 = vld [vmem:[%s685_s1 + $0x170] sm:$0xff]  ;;  %v70_v31 = vld [vmem:[%s685_s1 + $0x178] sm:$0xff]  ;;  %v369_v32 = vpack.c.bf16 %v38_v28, %v37_v27  ;;  %v15_v34 = vld [vmem:[%s684_s0] sm:$0xff] }
  0x1c   :  { %396 = vmatprep.subr.bf16.mxu1 %v395_v18  ;;  %v401_v33 = vpack.c.bf16 %v70_v31, %v69_v30  ;;  %v17_v35 = vld [vmem:[%s684_s0 + $0x10] sm:$0xff]  ;;  %v20_v36 = vld [vmem:[%s684_s0 + $0x28] sm:$0xff]  ;;  %v22_v37 = vld [vmem:[%s684_s0 + $0x38] sm:$0xff] }
  0x1d   :  { %366 = vmatpush3.bf16.msra.mxu0 %v365_v24  ;;  %v19_v38 = vld [vmem:[%s684_s0 + $0x20] sm:$0xff]  ;;  %v21_v39 = vld [vmem:[%s684_s0 + $0x30] sm:$0xff]  ;;  %s430_s0 = smov [#allocation2]  }
  0x1e   :  { %368 = vmatprep.subr.bf16.mxu0 %v367_v26  ;;  %v262_v41 = vld [vmem:[%s686_s2] ss:$0 sm:$0xff]  ;;  %s251_s22 = sshll.u32 %s430_s0, 4  ;;  %s252_s22 = int_to_ptr.vmem [resolvable:$true] %s251_s22 }
  0x1f   :  { %398 = vmatpush3.bf16.msra.mxu1 %v397_v25  ;;  %s406_s2 = scalar_lea.vmem %s252_s22, 256  ;;  %p411_p1 = scmp.lt.s32.totalorder %s252_s22, %s252_s22 }
  0x20   :  { %400 = vmatprep.subr.bf16.mxu1 %v399_v29  ;;  %p407_p0 = scmp.ne.s32.totalorder %s252_s22, %s406_s2  ;;  %p412_p2 = scmp.lt.s32.totalorder %s406_s2, %s406_s2 }
  0x21   :  { %370 = vmatpush3.bf16.msra.mxu0 %v369_v32 }
  0x22   :  { %p413_p3 = por %p412_p2, %p411_p1 }
  0x23   :  { %402 = vmatpush3.bf16.msra.mxu1 %v401_v33 }
  0x24   :  { %159 = vmatmul.mubr.f32.vlgmr.msra.gmra.mrb[0].mxu0 %v15_v34  ;;  %p414_p4 = pnand %p413_p3, %p407_p0 }
  0x25   :  { %163 = vmatprep.mubr.f32.mxu0 %v20_v36 }
  0x26   :  { %234 = vmatmul.mubr.f32.vlgmr.msra.gmra.mrb[0].mxu1 %v17_v35 }
  0x27   :  { %238 = vmatprep.mubr.f32.mxu1 %v22_v37 }
  0x28   :  { %164 = vmatmul.mubr.f32.gmra.mrb[2].mxu0 %v19_v38 }
  0x2a   :  { %239 = vmatmul.mubr.f32.gmra.mrb[2].mxu1 %v21_v39 }
  0xf7   :  { %v295_v40 = vpop.f32.mrb[0].mxu0 }
  0xf8   :  { %v296_v42 = vpop.f32.mrb[1].mxu0 }
  0xf9   :  { %v333_v43 = vpop.f32.mrb[0].mxu1  ;;  %v297_v44 = vadd.f32 %v296_v42, %v295_v40 }
  0xfa   :  { %v334_v45 = vpop.f32.mrb[1].mxu1 }
  0xfb   :  { %v335_v46 = vadd.f32 %v334_v45, %v333_v43  ;;  %v161_v47 = vadd.f32 %v297_v44, %v262_v41  ;;  %v298_v48 = vpop.f32.mrb[2].mxu0 }
  0xfc   :  { %v299_v49 = vpop.f32.mrb[3].mxu0 }
  0xfd   :  { %v336_v50 = vpop.f32.mrb[2].mxu1  ;;  %v236_v51 = vadd.f32 %v335_v46, %v161_v47  ;;  %v300_v52 = vadd.f32 %v299_v49, %v298_v48 }
  0xfe   :  { %v337_v53 = vpop.f32.mrb[3].mxu1 }
  0xff   :  { %v338_v54 = vadd.f32 %v337_v53, %v336_v50  ;;  %244 = vst [vmem:[#allocation2] sm:$0xff] %v236_v51  ;;  %v166_v55 = vadd.f32 %v300_v52, %v262_v41 }
 0x101   :  { %v241_v56 = vadd.f32 %v338_v54, %v166_v55 }
 0x103   :  { %245 = vst [vmem:[#allocation2 + $0x8] sm:$0xff] %v241_v56 }
 0x104   :  { %417 = shalt.err (!%p414_p4)
}
 0x105   :  { %s418_s25 = scalar_lea.hbm %s687_s3, 256 }
 0x106   :  { %p419_p5 = scmp.ne.s32.totalorder %s687_s3, %s418_s25  ;;  %p422_p6 = scmp.lt.u32.totalorder %s418_s25, %s687_s3 }
 0x108   :  { %p424_p7 = pnand %p422_p6, %p419_p5 }
 0x10a   :  { %427 = shalt.err (!%p424_p7)
}
 0x10b   :  { %s431_s30 = smov 128   ;;  %s432_s4 = smov 8  }
 0x10c   :  { %257 = dma.vmem_to_hbm [thread:$0]  %s252_s22, 256, %s687_s3, [#allocation3], %s431_s30, %s431_s30, %s432_s4  }
 0x10d   :  { %428 = dma.done.wait [#allocation3], 256  }
 0x10e   :  { %429 = vsyncadd [#allocation3], 4294967040 }
 0x10f   :  { %261 = vsyncpa [#allocation3], 1 }

</bundles_post_ra>
